<compile_context>
chip_gen: v7x
topology: tpu7x:2x2x1
jax: 0.10.0
libtpu: 0.0.40
codegen_flags: <defaults>
</compile_context>

<pallas_src>
import jax
import jax.numpy as jnp
from jax.experimental import pallas as pl
from jax.experimental.pallas import tpu as pltpu


def _triangular_kernel(params_ref, x_ref, o_ref):
    # params_ref: (2, tc, 1) -- [0] = diag(W), [1] = bias.
    # x_ref / o_ref: (tb, tc, tk).
    diag = params_ref[0]                              # (tc, 1), lane-0 vector
    bias = params_ref[1]                              # (tc, 1)
    y = x_ref[...] * diag + bias                      # bcast over (tb, ., tk)
    o_ref[...] = jnp.maximum(y, jnp.zeros((), dtype=y.dtype))   # ReLU


def _round_up(n, m):
    return ((n + m - 1) // m) * m


def _largest_divisor_tile(dim, unit, cap):
    """Largest multiple of `unit` that divides `dim` and is <= cap.
    `dim` must already be a multiple of `unit` (guaranteed by padding)."""
    t = max(unit, (min(cap, dim) // unit) * unit)
    while dim % t:
        t -= unit
    return t


def _largest_divisor_leq(n, cap):
    t = max(1, min(cap, n))
    while n % t:
        t -= 1
    return t


def _leading_axis_semantic():
    # v7x has 2 TensorCores per chip; only CORE_PARALLEL actually shards the
    # grid across them.  On single-TC chips (v5e/v6e) use plain PARALLEL.
    try:
        if "v7" in jax.devices()[0].device_kind.lower():
            return pltpu.CORE_PARALLEL
    except Exception:
        pass
    return pltpu.PARALLEL


def triangular_layer(x, weight, bias=None, *, force_pallas=False):
    """out[b, j, k] = relu(diag(weight)[j] * x[b, j, k] + bias[j, 0]).

    x: (B, C, K); weight: (C, C); bias: (C, 1) or None.
    """
    B, C, K = x.shape
    dtype = x.dtype
    itemsize = jnp.dtype(dtype).itemsize

    diag = jnp.diagonal(weight).reshape(C, 1).astype(dtype)
    b_vec = (jnp.zeros((C, 1), dtype) if bias is None
             else bias.reshape(C, 1).astype(dtype))

    # Tiny problems: let XLA fuse mul+add+relu; pallas_call dispatch + per-step
    # overhead would dominate.  The demo forces the Pallas path explicitly.
    if not force_pallas and x.size < (1 << 16):
        return jnp.maximum(x * diag[None] + b_vec[None], 0.0).astype(dtype)

    # Single fused per-channel parameter tensor: one small DMA stream.
    params = jnp.stack([diag, b_vec], axis=0)                  # (2, C, 1)

    # Sublane unit follows the packed min tile: (8,128) f32, (16,128) bf16,
    # (32,128) int8/fp8.
    unit_c = {4: 8, 2: 16, 1: 32}.get(itemsize, 8)

    # Pad to lane/sublane-dense sizes.  Never take a non-dividing full-K block:
    # large odd K would blow scoped VMEM, small K would degrade to masked vst.
    Cp, Kp = _round_up(C, unit_c), _round_up(K, 128)
    if (Cp, Kp) != (C, K):
        x = jnp.pad(x, ((0, 0), (0, Cp - C), (0, Kp - K)))
        params = jnp.pad(params, ((0, 0), (0, Cp - C), (0, 0)))

    # ~2 MiB per block: double-buffered in+out (~8 MiB) + the tiny params fit
    # every generation's scoped-VMEM default (v5e 16 MiB, v6e/v7x 32 MiB;
    # v7x physical VMEM is only 64 MiB so we stay well clear of it).
    budget = 2 << 20
    tk = _largest_divisor_tile(Kp, 128, 2048)
    tc = _largest_divisor_tile(Cp, unit_c,
                               max(unit_c, budget // (tk * itemsize)))
    tb = _largest_divisor_leq(B, max(1, budget // (tc * tk * itemsize)))

    lead_sem = _leading_axis_semantic()
    if lead_sem is pltpu.CORE_PARALLEL:
        # Keep >= 2 steps on the core-sharded axis when the batch allows it.
        while B // tb < 2 and tb > 1:
            tb = _largest_divisor_leq(B, tb - 1)

    grid = (B // tb, Cp // tc, Kp // tk)

    out = pl.pallas_call(
        _triangular_kernel,
        out_shape=jax.ShapeDtypeStruct((B, Cp, Kp), dtype),
        grid_spec=pltpu.PrefetchScalarGridSpec(
            num_scalar_prefetch=0,
            grid=grid,
            in_specs=[
                pl.BlockSpec((2, tc, 1), lambda b, c, k: (0, c, 0)),   # diag|bias
                pl.BlockSpec((tb, tc, tk), lambda b, c, k: (b, c, k)),  # x
            ],
            out_specs=pl.BlockSpec((tb, tc, tk), lambda b, c, k: (b, c, k)),
        ),
        compiler_params=pltpu.CompilerParams(
            dimension_semantics=(lead_sem, pltpu.PARALLEL, pltpu.PARALLEL),
            vmem_limit_bytes=32 << 20,
        ),
    )(params, x)

    if (Cp, Kp) != (C, K):
        out = out[:, :C, :K]
    return out


if __name__ == "__main__":
    B, C, K = 2, 8, 16  # batch, in_features (channel), sequence length

    key = jax.random.PRNGKey(0)
    kx, kb = jax.random.split(key)

    x = jax.random.normal(kx, (B, C, K), dtype=jnp.float32)
    # self.weight = torch.tril(torch.ones(C, C))  -> deterministic
    weight = jnp.tril(jnp.ones((C, C), dtype=jnp.float32))
    # self.bias = nn.Parameter(torch.Tensor(C, 1)) is uninitialized in PyTorch;
    # initialize deterministically here.
    bias = jax.random.normal(kb, (C, 1), dtype=jnp.float32)

    out = triangular_layer(x, weight, bias, force_pallas=True)
    out = jax.block_until_ready(out)

    # Reference check in plain JAX (same math as the PyTorch forward).
    ref = jnp.maximum(x * jnp.diagonal(weight)[None, :, None] + bias[None], 0.0)
    assert out.shape == ref.shape, "shape mismatch vs reference"
    assert jnp.allclose(out, ref, atol=1e-6), "mismatch vs reference"

    print("KERNEL_OK")
</pallas_src>

<mosaic_0001>
module attributes {stable_mosaic.version = 11 : i64} {
  func.func @_triangular_kernel(%arg0: i32, %arg1: i32, %arg2: i32, %arg3: memref<2x8x1xf32, #tpu.memory_space<vmem>>, %arg4: memref<2x8x128xf32, #tpu.memory_space<vmem>>, %arg5: memref<2x8x128xf32, #tpu.memory_space<vmem>>) attributes {dimension_semantics = [#tpu.dimension_semantics<parallel>, #tpu.dimension_semantics<parallel>, #tpu.dimension_semantics<parallel>], iteration_bounds = array<i64: 1, 1, 1>, scalar_prefetch = 0 : i64, scratch_operands = 0 : i64, tpu.core_type = #tpu.core_type<tc>, window_params = [{transform_indices = @transform_0, window_bounds = array<i64: 2, 8, 1>}, {transform_indices = @transform_1, window_bounds = array<i64: 2, 8, 128>}, {transform_indices = @transform_2, window_bounds = array<i64: 2, 8, 128>}]} {
    %c0 = arith.constant 0 : index
    %c0_0 = arith.constant 0 : index
    %c0_1 = arith.constant 0 : index
    %0 = vector.load %arg3[%c0, %c0_0, %c0_1] : memref<2x8x1xf32, #tpu.memory_space<vmem>>, vector<1x8x1xf32>
    %1 = vector.shape_cast %0 : vector<1x8x1xf32> to vector<8x1xf32>
    %c1 = arith.constant 1 : index
    %c0_2 = arith.constant 0 : index
    %c0_3 = arith.constant 0 : index
    %2 = vector.load %arg3[%c1, %c0_2, %c0_3] : memref<2x8x1xf32, #tpu.memory_space<vmem>>, vector<1x8x1xf32>
    %3 = vector.shape_cast %2 : vector<1x8x1xf32> to vector<8x1xf32>
    %c0_4 = arith.constant 0 : index
    %c0_5 = arith.constant 0 : index
    %c0_6 = arith.constant 0 : index
    %4 = vector.load %arg4[%c0_4, %c0_5, %c0_6] : memref<2x8x128xf32, #tpu.memory_space<vmem>>, vector<2x8x128xf32>
    %5 = vector.shape_cast %1 : vector<8x1xf32> to vector<1x8x1xf32>
    %6 = vector.broadcast %5 : vector<1x8x1xf32> to vector<2x8x128xf32>
    %7 = arith.mulf %4, %6 : vector<2x8x128xf32>
    %8 = vector.shape_cast %3 : vector<8x1xf32> to vector<1x8x1xf32>
    %9 = vector.broadcast %8 : vector<1x8x1xf32> to vector<2x8x128xf32>
    %10 = arith.addf %7, %9 : vector<2x8x128xf32>
    %cst = arith.constant 0.000000e+00 : f32
    %11 = vector.broadcast %cst : f32 to vector<2x8x128xf32>
    %12 = arith.maximumf %10, %11 : vector<2x8x128xf32>
    %c0_7 = arith.constant 0 : index
    %c0_8 = arith.constant 0 : index
    %c0_9 = arith.constant 0 : index
    %13 = vector.load %arg5[%c0_7, %c0_8, %c0_9] : memref<2x8x128xf32, #tpu.memory_space<vmem>>, vector<2x8x128xf32>
    tpu.vector_store %arg5[%c0_7, %c0_8, %c0_9], %12 {strides = array<i32>} : memref<2x8x128xf32, #tpu.memory_space<vmem>>, vector<2x8x128xf32>,
    return
  }
  func.func @transform_0(%arg0: i32, %arg1: i32, %arg2: i32) -> (i32, i32, i32) {
    %c0_i32 = arith.constant 0 : i32
    %c0_i32_0 = arith.constant 0 : i32
    %c0_i32_1 = arith.constant 0 : i32
    return %c0_i32, %arg1, %c0_i32_0 : i32, i32, i32
  }
  func.func @transform_1(%arg0: i32, %arg1: i32, %arg2: i32) -> (i32, i32, i32) {
    %c0_i32 = arith.constant 0 : i32
    return %arg0, %arg1, %arg2 : i32, i32, i32
  }
  func.func @transform_2(%arg0: i32, %arg1: i32, %arg2: i32) -> (i32, i32, i32) {
    %c0_i32 = arith.constant 0 : i32
    return %arg0, %arg1, %arg2 : i32, i32, i32
  }
}

</mosaic_0001>

<bundles_post_ra>
// kernel: tpu_custom_call.1
= control target key start
LH: loop header
LB: loop body
LE: loop exit
PB: predicated region body
PF: predicated region fallthrough
CT: control target
= control target key end

     0   :  { %v81_v1 = vmov 0   ;;  %s124_s0 = inlined_call_operand.vmem [shape: f32[2,8,1], index: 0, kind: input, shape index: {}]   ;;  %s125_s1 = inlined_call_operand.vmem [shape: f32[2,8,128], index: 1, kind: input, shape index: {}]   ;;  %s126_s2 = inlined_call_operand.hbm [shape: f32[2,8,128], index: 2, kind: output, shape index: {}]  }
   0x1   :  { %v12_v0 = vld [vmem:[%s124_s0] sm:$0xff]  ;;  %56 = vset.pattern.permute.xlu0 %v81_v1 }
   0x2   :  { %7 = vsyncpa [#allocation3], 0  ;;  %19 = vperm.xlu0 %56, %v12_v0   ;;  %v51_v2 = vld [vmem:[%s124_s0 + $0x8] sm:$0xff]  ;;  %v15_v3 = vld [vmem:[%s125_s1] sm:$0xff]  ;;  %s82_s17 = smov [#allocation2]  }
   0x3   :  { %v16_v4 = vld [vmem:[%s125_s1 + $0x8] sm:$0xff]  ;;  %s40_s18 = sshll.u32 %s82_s17, 4  ;;  %s41_s18 = int_to_ptr.vmem [resolvable:$true] %s40_s18 }
   0x4   :  { %s57_s0 = scalar_lea.vmem %s41_s18, 256  ;;  %p62_p1 = scmp.lt.s32.totalorder %s41_s18, %s41_s18 }
   0x5   :  { %p58_p0 = scmp.ne.s32.totalorder %s41_s18, %s57_s0  ;;  %p63_p2 = scmp.lt.s32.totalorder %s57_s0, %s57_s0 }
   0x6   :  { %26 = vperm.xlu0 %56, %v51_v2  }
   0x7   :  { %p64_p3 = por %p63_p2, %p62_p1 }
   0x9   :  { %p65_p4 = pnand %p64_p3, %p58_p0 }
  0x81   :  { %v20_v5 = vpop.permute.xlu0 %19 }
  0x82   :  { %v22_v6 = vmul.f32 %v20_v5, %v15_v3  ;;  %v23_v7 = vmul.f32 %v20_v5, %v16_v4 }
  0x85   :  { %v27_v8 = vpop.permute.xlu0 %26 }
  0x86   :  { %v29_v9 = vadd.f32 %v27_v8, %v22_v6  ;;  %v30_v10 = vadd.f32 %v27_v8, %v23_v7 }
  0x88   :  { %v31_v11 = vmax.f32 %v29_v9, 0.0  ;;  %v32_v12 = vmax.f32 %v30_v10, 0.0 }
  0x8a   :  { %33 = vst [vmem:[#allocation2] sm:$0xff] %v31_v11  ;;  %34 = vst [vmem:[#allocation2 + $0x8] sm:$0xff] %v32_v12 }
  0x8b   :  { %68 = shalt.err (!%p65_p4)
}
  0x8c   :  { %s69_s20 = scalar_lea.hbm %s126_s2, 256 }
  0x8d   :  { %p70_p5 = scmp.ne.s32.totalorder %s126_s2, %s69_s20  ;;  %p73_p6 = scmp.lt.u32.totalorder %s69_s20, %s126_s2 }
  0x8f   :  { %p75_p7 = pnand %p73_p6, %p70_p5 }
  0x91   :  { %78 = shalt.err (!%p75_p7)
}
  0x92   :  { %s83_s25 = smov 128   ;;  %s84_s26 = smov 8  }
  0x93   :  { %46 = dma.vmem_to_hbm [thread:$0]  %s41_s18, 256, %s126_s2, [#allocation3], %s83_s25, %s83_s25, %s84_s26  }
  0x94   :  { %79 = dma.done.wait [#allocation3], 256  }
  0x95   :  { %80 = vsyncadd [#allocation3], 4294967040 }
  0x96   :  { %50 = vsyncpa [#allocation3], 1 }

</bundles_post_ra>
